<compile_context>
chip_gen: v6e
topology: v6e:2x2x1
jax: 0.10.0
libtpu: 0.0.40
codegen_flags: <defaults>
</compile_context>

<pallas_src>
import functools
import math

import jax
import jax.numpy as jnp
from jax import lax
from jax.experimental import pallas as pl
from jax.experimental.pallas import tpu as pltpu


def _round_up(v, m):
    return ((v + m - 1) // m) * m


def _nbytes(shape, dtype):
    return math.prod(shape) * jnp.dtype(dtype).itemsize


def lora_linear_kernel(x_ref, w_ref, bias_ref, a_ref, bt_ref, o_ref,
                       acc_ref, lacc_ref, *, scaling, r, use_vpu_lora):
    """One (tm, tn) output tile, accumulated over the K grid axis."""
    k = pl.program_id(2)
    nk = pl.num_programs(2)

    @pl.when(k == 0)
    def _():
        acc_ref[...] = jnp.zeros_like(acc_ref)
        lacc_ref[...] = jnp.zeros_like(lacc_ref)

    x = x_ref[...]                                        # (tm, tk)

    # Main matmul: x (tm, tk) contracted with W (tn, tk) on the K axis (trans-B).
    acc_ref[...] += lax.dot_general(
        x, w_ref[...],
        dimension_numbers=(((1,), (1,)), ((), ())),
        preferred_element_type=jnp.float32)

    # LoRA A: x (tm, tk) contracted with A (r, tk) -> (tm, r), kept in f32.
    lacc_ref[...] += lax.dot_general(
        x, a_ref[...],
        dimension_numbers=(((1,), (1,)), ((), ())),
        preferred_element_type=jnp.float32)

    @pl.when(k == nk - 1)
    def _():
        a_s = lacc_ref[...] * scaling                     # (tm, r) — cheap scale
        bt = bt_ref[...]                                  # (r, tn)
        out = acc_ref[...] + bias_ref[...]
        if use_vpu_lora:
            # rank-r update as r broadcast FMAs on the VPU (MXU stays free).
            for j in range(r):
                out = out + a_s[:, j:j + 1] * bt[j:j + 1, :]
        else:
            out = out + lax.dot_general(
                a_s, bt,
                dimension_numbers=(((1,), (0,)), ((), ())),
                preferred_element_type=jnp.float32)
        o_ref[...] = out.astype(o_ref.dtype)


def lora_linear(x, w, bias, lora_a, lora_b, *, lora_alpha, r,
                tm=256, tn=512, tk=512):
    """x: [..., in]; w: [out, in]; bias: [out]; lora_a: [r, in]; lora_b: [out, r]."""
    orig_shape = x.shape
    N, K = w.shape
    assert orig_shape[-1] == K
    x2 = x.reshape(-1, K)
    M = x2.shape[0]

    # ---- tile selection (respects the (8,128) blocking rules) ----
    # N / K tiles: multiples of 128 that divide the dim when possible,
    # otherwise fall back to the full (small) dim.
    tn = math.gcd(N, tn) if (N % 128 == 0) else N
    tk = math.gcd(K, tk) if (K % 128 == 0) else K
    # M tile: clamp to (sublane-rounded) M and zero-pad rows so the grid divides.
    tm = min(tm, _round_up(M, 8))
    m_pad = _round_up(M, tm)
    if m_pad != M:
        x2 = jnp.pad(x2, ((0, m_pad - M), (0, 0)))

    scaling = lora_alpha / r
    use_vpu_lora = r <= 16

    bias2 = bias.reshape(1, N)
    bt = lora_b.T                       # (r, N) — tiny, negligible HBM traffic

    # ---- explicit VMEM budget (double-buffered inputs/outputs + accumulators) ----
    vmem_est = 2 * (_nbytes((tm, tk), x2.dtype) + _nbytes((tn, tk), w.dtype)
                    + _nbytes((1, tn), bias2.dtype) + _nbytes((r, tk), lora_a.dtype)
                    + _nbytes((r, tn), bt.dtype) + _nbytes((tm, tn), x2.dtype))
    vmem_est += _nbytes((tm, tn), jnp.float32) + _nbytes((tm, r), jnp.float32)
    vmem_limit = int(min(64 << 20, max(16 << 20, 2 * vmem_est)))

    kernel = functools.partial(lora_linear_kernel, scaling=scaling, r=r,
                               use_vpu_lora=use_vpu_lora)

    out2 = pl.pallas_call(
        kernel,
        out_shape=jax.ShapeDtypeStruct((m_pad, N), x.dtype),
        grid_spec=pltpu.PrefetchScalarGridSpec(
            num_scalar_prefetch=0,
            grid=(m_pad // tm, N // tn, K // tk),
            in_specs=[
                pl.BlockSpec((tm, tk), lambda i, j, k: (i, k)),   # x rows
                pl.BlockSpec((tn, tk), lambda i, j, k: (j, k)),   # W [out, in]
                pl.BlockSpec((1, tn), lambda i, j, k: (0, j)),    # bias
                pl.BlockSpec((r, tk), lambda i, j, k: (0, k)),    # lora_A [r, in]
                pl.BlockSpec((r, tn), lambda i, j, k: (0, j)),    # lora_B^T [r, out]
            ],
            out_specs=pl.BlockSpec((tm, tn), lambda i, j, k: (i, j)),
            scratch_shapes=[
                pltpu.VMEM((tm, tn), jnp.float32),                # main accumulator
                pltpu.VMEM((tm, r), jnp.float32),                 # LoRA-A accumulator
            ]),
        compiler_params=pltpu.CompilerParams(
            dimension_semantics=("parallel", "parallel", "arbitrary"),
            vmem_limit_bytes=vmem_limit),
    )(x2, w, bias2, lora_a, bt)

    out2 = out2[:M]
    return out2.reshape(*orig_shape[:-1], N)


def init_params(key, in_features, out_features, r):
    """Deterministic init mirroring the PyTorch module's __init__."""
    k_w, k_b, k_a = jax.random.split(key, 3)
    bound = 1.0 / math.sqrt(in_features)
    w = jax.random.uniform(k_w, (out_features, in_features), jnp.float32,
                           -bound, bound)
    bias = jax.random.uniform(k_b, (out_features,), jnp.float32, -bound, bound)
    lora_a = jax.random.uniform(k_a, (r, in_features), jnp.float32, -bound, bound)
    lora_b = jnp.zeros((out_features, r), jnp.float32)
    return w, bias, lora_a, lora_b


def reference(x, w, bias, lora_a, lora_b, *, lora_alpha, r):
    """Pure-JAX reference of the PyTorch forward (dropout p=0 -> identity)."""
    hp = jax.lax.Precision.HIGHEST
    scaling = lora_alpha / r
    orig = jnp.einsum('...k,nk->...n', x, w, precision=hp) + bias
    a = jnp.einsum('...k,rk->...r', x, lora_a, precision=hp)
    lora = jnp.einsum('...r,nr->...n', a, lora_b, precision=hp) * scaling
    return orig + lora


if __name__ == "__main__":
    key = jax.random.PRNGKey(0)

    # --- Test 1: module-faithful small config (lora_B == 0 as in __init__) ---
    batch, seq, in_f, out_f, r = 2, 8, 32, 32, 4
    lora_alpha = 1.0
    k_x, k_p, k_b2, k_x2, k_p2, k_b3 = jax.random.split(key, 6)
    x = jax.random.normal(k_x, (batch, seq, in_f), jnp.float32)
    w, bias, lora_a, lora_b = init_params(k_p, in_f, out_f, r)

    out = lora_linear(x, w, bias, lora_a, lora_b, lora_alpha=lora_alpha, r=r)
    out = jax.block_until_ready(out)
    ref = reference(x, w, bias, lora_a, lora_b, lora_alpha=lora_alpha, r=r)
    assert out.shape == ref.shape
    assert jnp.allclose(out, ref, atol=5e-3, rtol=5e-3), "mismatch (small/zero-B)"

    # Nonzero lora_B so the LoRA path is actually exercised.
    lora_b_nz = jax.random.normal(k_b2, (out_f, r), jnp.float32) * 0.1
    out_nz = lora_linear(x, w, bias, lora_a, lora_b_nz, lora_alpha=lora_alpha, r=r)
    out_nz = jax.block_until_ready(out_nz)
    ref_nz = reference(x, w, bias, lora_a, lora_b_nz, lora_alpha=lora_alpha, r=r)
    assert jnp.allclose(out_nz, ref_nz, atol=5e-3, rtol=5e-3), "mismatch (nonzero B)"

    # --- Test 2: exercises M/N/K tiling, K accumulation and ragged-M padding ---
    batch2, seq2, in_f2, out_f2, r2 = 3, 170, 1024, 384, 8   # M=510 (padded to 512)
    lora_alpha2 = 16.0
    x2 = jax.random.normal(k_x2, (batch2, seq2, in_f2), jnp.float32)
    w2, bias2, lora_a2, _ = init_params(k_p2, in_f2, out_f2, r2)
    lora_b2 = jax.random.normal(k_b3, (out_f2, r2), jnp.float32) * 0.05

    out2 = lora_linear(x2, w2, bias2, lora_a2, lora_b2,
                       lora_alpha=lora_alpha2, r=r2)
    out2 = jax.block_until_ready(out2)
    ref2 = reference(x2, w2, bias2, lora_a2, lora_b2,
                     lora_alpha=lora_alpha2, r=r2)
    assert out2.shape == ref2.shape
    assert jnp.allclose(out2, ref2, atol=5e-3, rtol=5e-3), "mismatch (tiled config)"

    print("KERNEL_OK")
</pallas_src>

<mosaic_0001>
module attributes {stable_mosaic.version = 11 : i64} {
  func.func @lora_linear_kernel(%arg0: i32, %arg1: i32, %arg2: i32, %arg3: memref<16x32xf32, #tpu.memory_space<vmem>>, %arg4: memref<32x32xf32, #tpu.memory_space<vmem>>, %arg5: memref<1x32xf32, #tpu.memory_space<vmem>>, %arg6: memref<4x32xf32, #tpu.memory_space<vmem>>, %arg7: memref<4x32xf32, #tpu.memory_space<vmem>>, %arg8: memref<16x32xf32, #tpu.memory_space<vmem>>, %arg9: memref<16x32xf32, #tpu.memory_space<vmem>>, %arg10: memref<16x4xf32, #tpu.memory_space<vmem>>) attributes {dimension_semantics = [#tpu.dimension_semantics<parallel>, #tpu.dimension_semantics<parallel>, #tpu.dimension_semantics<arbitrary>], iteration_bounds = array<i64: 1, 1, 1>, scalar_prefetch = 0 : i64, scratch_operands = 2 : i64, tpu.core_type = #tpu.core_type<tc>, window_params = [{transform_indices = @transform_0, window_bounds = array<i64: 16, 32>}, {transform_indices = @transform_1, window_bounds = array<i64: 32, 32>}, {transform_indices = @transform_2, window_bounds = array<i64: 1, 32>}, {transform_indices = @transform_3, window_bounds = array<i64: 4, 32>}, {transform_indices = @transform_4, window_bounds = array<i64: 4, 32>}, {transform_indices = @transform_5, window_bounds = array<i64: 16, 32>}]} {
    %c0_i32 = arith.constant 0 : i32
    %0 = arith.cmpi eq, %arg2, %c0_i32 : i32
    %1 = arith.extui %0 : i1 to i32
    %c0_i32_0 = arith.constant 0 : i32
    %2 = arith.cmpi ne, %1, %c0_i32_0 : i32
    scf.if %2 {
      %cst_17 = arith.constant 0.000000e+00 : f32
      %17 = vector.broadcast %cst_17 : f32 to vector<16x32xf32>
      %c0_18 = arith.constant 0 : index
      %c0_19 = arith.constant 0 : index
      %18 = vector.load %arg9[%c0_18, %c0_19] : memref<16x32xf32, #tpu.memory_space<vmem>>, vector<16x32xf32>
      tpu.vector_store %arg9[%c0_18, %c0_19], %17 {strides = array<i32>} : memref<16x32xf32, #tpu.memory_space<vmem>>, vector<16x32xf32>,
      %cst_20 = arith.constant 0.000000e+00 : f32
      %19 = vector.broadcast %cst_20 : f32 to vector<16x4xf32>
      %c0_21 = arith.constant 0 : index
      %c0_22 = arith.constant 0 : index
      %20 = vector.load %arg10[%c0_21, %c0_22] : memref<16x4xf32, #tpu.memory_space<vmem>>, vector<16x4xf32>
      tpu.vector_store %arg10[%c0_21, %c0_22], %19 {strides = array<i32>} : memref<16x4xf32, #tpu.memory_space<vmem>>, vector<16x4xf32>,
    } else {
    }
    %c0 = arith.constant 0 : index
    %c0_1 = arith.constant 0 : index
    %3 = vector.load %arg3[%c0, %c0_1] : memref<16x32xf32, #tpu.memory_space<vmem>>, vector<16x32xf32>
    %c0_2 = arith.constant 0 : index
    %c0_3 = arith.constant 0 : index
    %4 = vector.load %arg9[%c0_2, %c0_3] : memref<16x32xf32, #tpu.memory_space<vmem>>, vector<16x32xf32>
    %c0_4 = arith.constant 0 : index
    %c0_5 = arith.constant 0 : index
    %5 = vector.load %arg4[%c0_4, %c0_5] : memref<32x32xf32, #tpu.memory_space<vmem>>, vector<32x32xf32>
    %cst = arith.constant dense<0.000000e+00> : vector<16x32xf32>
    %6 = tpu.matmul %3, %5, %cst {dimension_numbers = #tpu.dot_dimension_numbers<[1], [1], [0], [0], [0, 0, 1, 0], [], []>} : vector<16x32xf32>, vector<32x32xf32>, vector<16x32xf32> -> vector<16x32xf32>
    %7 = arith.addf %4, %6 : vector<16x32xf32>
    %c0_6 = arith.constant 0 : index
    %c0_7 = arith.constant 0 : index
    %8 = vector.load %arg9[%c0_6, %c0_7] : memref<16x32xf32, #tpu.memory_space<vmem>>, vector<16x32xf32>
    tpu.vector_store %arg9[%c0_6, %c0_7], %7 {strides = array<i32>} : memref<16x32xf32, #tpu.memory_space<vmem>>, vector<16x32xf32>,
    %c0_8 = arith.constant 0 : index
    %c0_9 = arith.constant 0 : index
    %9 = vector.load %arg10[%c0_8, %c0_9] : memref<16x4xf32, #tpu.memory_space<vmem>>, vector<16x4xf32>
    %c0_10 = arith.constant 0 : index
    %c0_11 = arith.constant 0 : index
    %10 = vector.load %arg6[%c0_10, %c0_11] : memref<4x32xf32, #tpu.memory_space<vmem>>, vector<4x32xf32>
    %cst_12 = arith.constant dense<0.000000e+00> : vector<16x4xf32>
    %11 = tpu.matmul %3, %10, %cst_12 {dimension_numbers = #tpu.dot_dimension_numbers<[1], [1], [0], [0], [0, 0, 1, 0], [], []>} : vector<16x32xf32>, vector<4x32xf32>, vector<16x4xf32> -> vector<16x4xf32>
    %12 = arith.addf %9, %11 : vector<16x4xf32>
    %c0_13 = arith.constant 0 : index
    %c0_14 = arith.constant 0 : index
    %13 = vector.load %arg10[%c0_13, %c0_14] : memref<16x4xf32, #tpu.memory_space<vmem>>, vector<16x4xf32>
    tpu.vector_store %arg10[%c0_13, %c0_14], %12 {strides = array<i32>} : memref<16x4xf32, #tpu.memory_space<vmem>>, vector<16x4xf32>,
    %c0_i32_15 = arith.constant 0 : i32
    %14 = arith.cmpi eq, %arg2, %c0_i32_15 : i32
    %15 = arith.extui %14 : i1 to i32
    %c0_i32_16 = arith.constant 0 : i32
    %16 = arith.cmpi ne, %15, %c0_i32_16 : i32
    scf.if %16 {
      %c0_17 = arith.constant 0 : index
      %c0_18 = arith.constant 0 : index
      %17 = vector.load %arg10[%c0_17, %c0_18] : memref<16x4xf32, #tpu.memory_space<vmem>>, vector<16x4xf32>
      %cst_19 = arith.constant 2.500000e-01 : f32
      %18 = vector.broadcast %cst_19 : f32 to vector<16x4xf32>
      %19 = arith.mulf %17, %18 : vector<16x4xf32>
      %c0_20 = arith.constant 0 : index
      %c0_21 = arith.constant 0 : index
      %20 = vector.load %arg7[%c0_20, %c0_21] : memref<4x32xf32, #tpu.memory_space<vmem>>, vector<4x32xf32>
      %c0_22 = arith.constant 0 : index
      %c0_23 = arith.constant 0 : index
      %21 = vector.load %arg9[%c0_22, %c0_23] : memref<16x32xf32, #tpu.memory_space<vmem>>, vector<16x32xf32>
      %c0_24 = arith.constant 0 : index
      %c0_25 = arith.constant 0 : index
      %22 = vector.load %arg5[%c0_24, %c0_25] : memref<1x32xf32, #tpu.memory_space<vmem>>, vector<1x32xf32>
      %23 = vector.broadcast %22 : vector<1x32xf32> to vector<16x32xf32>
      %24 = arith.addf %21, %23 : vector<16x32xf32>
      %25 = vector.extract_strided_slice %19 {offsets = [0, 0], sizes = [16, 1], strides = [1, 1]} : vector<16x4xf32> to vector<16x1xf32>
      %26 = vector.extract_strided_slice %20 {offsets = [0, 0], sizes = [1, 32], strides = [1, 1]} : vector<4x32xf32> to vector<1x32xf32>
      %27 = vector.broadcast %25 : vector<16x1xf32> to vector<16x32xf32>
      %28 = vector.broadcast %26 : vector<1x32xf32> to vector<16x32xf32>
      %29 = arith.mulf %27, %28 : vector<16x32xf32>
      %30 = arith.addf %24, %29 : vector<16x32xf32>
      %31 = vector.extract_strided_slice %19 {offsets = [0, 1], sizes = [16, 1], strides = [1, 1]} : vector<16x4xf32> to vector<16x1xf32>
      %32 = vector.extract_strided_slice %20 {offsets = [1, 0], sizes = [1, 32], strides = [1, 1]} : vector<4x32xf32> to vector<1x32xf32>
      %33 = vector.broadcast %31 : vector<16x1xf32> to vector<16x32xf32>
      %34 = vector.broadcast %32 : vector<1x32xf32> to vector<16x32xf32>
      %35 = arith.mulf %33, %34 : vector<16x32xf32>
      %36 = arith.addf %30, %35 : vector<16x32xf32>
      %37 = vector.extract_strided_slice %19 {offsets = [0, 2], sizes = [16, 1], strides = [1, 1]} : vector<16x4xf32> to vector<16x1xf32>
      %38 = vector.extract_strided_slice %20 {offsets = [2, 0], sizes = [1, 32], strides = [1, 1]} : vector<4x32xf32> to vector<1x32xf32>
      %39 = vector.broadcast %37 : vector<16x1xf32> to vector<16x32xf32>
      %40 = vector.broadcast %38 : vector<1x32xf32> to vector<16x32xf32>
      %41 = arith.mulf %39, %40 : vector<16x32xf32>
      %42 = arith.addf %36, %41 : vector<16x32xf32>
      %43 = vector.extract_strided_slice %19 {offsets = [0, 3], sizes = [16, 1], strides = [1, 1]} : vector<16x4xf32> to vector<16x1xf32>
      %44 = vector.extract_strided_slice %20 {offsets = [3, 0], sizes = [1, 32], strides = [1, 1]} : vector<4x32xf32> to vector<1x32xf32>
      %45 = vector.broadcast %43 : vector<16x1xf32> to vector<16x32xf32>
      %46 = vector.broadcast %44 : vector<1x32xf32> to vector<16x32xf32>
      %47 = arith.mulf %45, %46 : vector<16x32xf32>
      %48 = arith.addf %42, %47 : vector<16x32xf32>
      %c0_26 = arith.constant 0 : index
      %c0_27 = arith.constant 0 : index
      %49 = vector.load %arg8[%c0_26, %c0_27] : memref<16x32xf32, #tpu.memory_space<vmem>>, vector<16x32xf32>
      tpu.vector_store %arg8[%c0_26, %c0_27], %48 {strides = array<i32>} : memref<16x32xf32, #tpu.memory_space<vmem>>, vector<16x32xf32>,
    } else {
    }
    return
  }
  func.func @transform_0(%arg0: i32, %arg1: i32, %arg2: i32) -> (i32, i32) {
    %c0_i32 = arith.constant 0 : i32
    return %arg0, %arg2 : i32, i32
  }
  func.func @transform_1(%arg0: i32, %arg1: i32, %arg2: i32) -> (i32, i32) {
    %c0_i32 = arith.constant 0 : i32
    return %arg1, %arg2 : i32, i32
  }
  func.func @transform_2(%arg0: i32, %arg1: i32, %arg2: i32) -> (i32, i32) {
    %c0_i32 = arith.constant 0 : i32
    %c0_i32_0 = arith.constant 0 : i32
    return %c0_i32, %arg1 : i32, i32
  }
  func.func @transform_3(%arg0: i32, %arg1: i32, %arg2: i32) -> (i32, i32) {
    %c0_i32 = arith.constant 0 : i32
    %c0_i32_0 = arith.constant 0 : i32
    return %c0_i32, %arg2 : i32, i32
  }
  func.func @transform_4(%arg0: i32, %arg1: i32, %arg2: i32) -> (i32, i32) {
    %c0_i32 = arith.constant 0 : i32
    %c0_i32_0 = arith.constant 0 : i32
    return %c0_i32, %arg1 : i32, i32
  }
  func.func @transform_5(%arg0: i32, %arg1: i32, %arg2: i32) -> (i32, i32) {
    %c0_i32 = arith.constant 0 : i32
    return %arg0, %arg1 : i32, i32
  }
}

</mosaic_0001>

<bundles_post_ra>
// kernel: tpu_custom_call.1
= control target key start
LH: loop header
LB: loop body
LE: loop exit
PB: predicated region body
PF: predicated region fallthrough
CT: control target
= control target key end

     0   :  { %10 = vsyncpa [#allocation5], 0  ;;  %s598_s0 = inlined_call_operand.hbm [shape: f32[16,32], index: 0, kind: input, shape index: {}]   ;;  %s599_s1 = inlined_call_operand.hbm [shape: f32[32,32], index: 1, kind: input, shape index: {}]   ;;  %s600_s2 = inlined_call_operand.vmem [shape: f32[1,32], index: 2, kind: input, shape index: {}]   ;;  %s601_s3 = inlined_call_operand.vmem [shape: f32[4,32], index: 3, kind: input, shape index: {}]   ;;  %s602_s4 = inlined_call_operand.hbm [shape: f32[4,32], index: 4, kind: input, shape index: {}]   ;;  %s603_s5 = inlined_call_operand.hbm [shape: f32[16,32], index: 5, kind: output, shape index: {}]  }
   0x1   :  { %11 = vsyncpa [#allocation8], 0 }
   0x2   :  { %12 = vsyncpa [#allocation6], 0  ;;  %s506_s18 = smov [#allocation7]   ;;  %s507_s20 = smov [#allocation4]  }
   0x3   :  { %s30_s19 = sshll.u32 %s506_s18, 4  ;;  %s18_s21 = sshll.u32 %s507_s20, 4  ;;  %s31_s19 = int_to_ptr.vmem [resolvable:$true] %s30_s19  ;;  %s19_s21 = int_to_ptr.vmem [resolvable:$true] %s18_s21 }
   0x4   :  { %s428_s22 = scalar_lea.vmem %s31_s19, 512  ;;  %p433_p1 = scmp.lt.s32.totalorder %s31_s19, %s31_s19 }
   0x5   :  { %p429_p0 = scmp.ne.s32.totalorder %s31_s19, %s428_s22  ;;  %p434_p2 = scmp.lt.s32.totalorder %s428_s22, %s428_s22 }
   0x7   :  { %p435_p3 = por %p434_p2, %p433_p1 }
   0x9   :  { %p436_p4 = pnand %p435_p3, %p429_p0 }
   0xb   :  { %439 = shalt.err (!%p436_p4)
}
   0xc   :  { %s508_s23 = smov 128   ;;  %s509_s24 = smov 8  }
   0xd   :  { %36 = dma.hbm_to_vmem [thread:$0]  %s599_s1, 512, %s31_s19, [#allocation8], %s508_s23, %s508_s23, %s509_s24  }
   0xe   :  { %s448_s27 = scalar_lea.vmem %s19_s21, 256  ;;  %p453_p6 = scmp.lt.s32.totalorder %s19_s21, %s19_s21 }
   0xf   :  { %p449_p5 = scmp.ne.s32.totalorder %s19_s21, %s448_s27  ;;  %p454_p7 = scmp.lt.s32.totalorder %s448_s27, %s448_s27 }
  0x11   :  { %p455_p8 = por %p454_p7, %p453_p6 }
  0x13   :  { %p456_p9 = pnand %p455_p8, %p449_p5 }
  0x15   :  { %459 = shalt.err (!%p456_p9)
}
  0x16   :  { %24 = dma.hbm_to_vmem [thread:$0]  %s598_s0, 256, %s19_s21, [#allocation5], %s508_s23, %s508_s23, %s509_s24  }
  0x17   :  { %s510_s30 = smov [#allocation9]  }
  0x18   :  { %s47_s6 = sshll.u32 %s510_s30, 4  ;;  %s48_s6 = int_to_ptr.vmem [resolvable:$true] %s47_s6 }
  0x19   :  { %s468_s7 = scalar_lea.vmem %s48_s6, 64  ;;  %p473_p11 = scmp.lt.s32.totalorder %s48_s6, %s48_s6 }
  0x1a   :  { %p469_p10 = scmp.ne.s32.totalorder %s48_s6, %s468_s7  ;;  %p474_p12 = scmp.lt.s32.totalorder %s468_s7, %s468_s7 }
  0x1c   :  { %p475_p13 = por %p474_p12, %p473_p11 }
  0x1e   :  { %p476_p0 = pnand %p475_p13, %p469_p10 }
  0x20   :  { %479 = shalt.err (!%p476_p0)
}
  0x21   :  { %50 = dma.hbm_to_vmem [thread:$0]  %s602_s4, 64, %s48_s6, [#allocation8]  }
  0x22   :  { %500 = dma.done.wait [#allocation5], 256  }
  0x23   :  { %501 = vsyncadd [#allocation5], 4294967040 }
  0x24   :  { %502 = dma.done.wait [#allocation8], 576  }
  0x25   :  { %503 = vsyncadd [#allocation8], 4294966720  ;;  %vm64_vm0 = vcmask 261120   ;;  %vm67_vm1 = vcmask 31744   ;;  %v511_v0 = vmov 0.0   ;;  %v70_v2 = vld [vmem:[#allocation4] sm:$0xff]  ;;  %v291_v28 = vlaneseq }
  0x26   :  { %69 = vst.msk [vmem:[#allocation3 + $0x8] sm:$0xff] %vm67_vm1, %v511_v0  ;;  %68 = vst.msk [vmem:[#allocation3] sm:$0xff] %vm67_vm1, %v511_v0  ;;  %v178_v1 = vld [vmem:[%s601_s3] sm:$0xf]  ;;  %399 = vmatprep.mubr.msk.f32.mxu1 %vm64_vm0, %v70_v2  ;;  %v77_v3 = vld [vmem:[#allocation7 + $0x18] sm:$0xff]  ;;  %394 = vmatprep.mubr.msk.f32.mxu0 %vm64_vm0, %v70_v2  ;;  %v512_v8 = vmov 1  }
  0x27   :  { %65 = vst.msk [vmem:[#allocation2] sm:$0xff] %vm64_vm0, %v511_v0  ;;  %66 = vst.msk [vmem:[#allocation2 + $0x8] sm:$0xff] %vm64_vm0, %v511_v0  ;;  %397 = vmatprep.subr.msk.mxu1 %vm64_vm0, %v178_v1  ;;  %v76_v4 = vld [vmem:[#allocation7 + $0x10] sm:$0xff]  ;;  %v71_v5 = vld [vmem:[#allocation4 + $0x8] sm:$0xff]  ;;  %386 = vmatprep.subr.msk.mxu0 %vm64_vm0, %v77_v3  ;;  %v513_v9 = vmov 0   ;;  %v514_v26 = vmov 2  }
  0x28   :  { %398 = vmatpush3.xpose.msk.msra.mxu1 %vm64_vm0, %v178_v1  ;;  %387 = vmatpush3.xpose.msk.msra.mxu0 %vm64_vm0, %v77_v3  ;;  %v75_v6 = vld [vmem:[#allocation7 + $0x8] sm:$0xff]  ;;  %v74_v7 = vld [vmem:[#allocation7] sm:$0xff]  ;;  %v515_v27 = vmov 3   ;;  %v292_v29 = vshrl.u32 %v291_v28, 7  ;;  %v376_v34 = vld [vmem:[%s600_s2] ss:$0 sm:$0xff] }
  0x29   :  { %388 = vmatprep.subr.msk.mxu0 %vm64_vm0, %v76_v4  ;;  %414 = vset.pattern.permute.xlu1 %v512_v8  ;;  %v269_v31 = vld [vmem:[#allocation9] sm:$0xf]  ;;  %s516_s2 = smov [#allocation10]  }
  0x2a   :  { %413 = vset.pattern.permute.xlu0 %v513_v9  ;;  %v293_v30 = vsub.s32 0, %v292_v29  ;;  %v309_v37 = vsub.s32 1, %v292_v29  ;;  %v325_v40 = vsub.s32 2, %v292_v29  ;;  %v341_v45 = vsub.s32 3, %v292_v29  ;;  %s354_s10 = sshll.u32 %s516_s2, 4  ;;  %s355_s10 = int_to_ptr.vmem [resolvable:$true] %s354_s10 }
  0x2b   :  { %400 = vmatmul.mubr.msk.f32.vlgmr.msra.gmra.mxu1 %vm64_vm0, %v71_v5  ;;  %s480_s11 = scalar_lea.vmem %s355_s10, 256  ;;  %p485_p2 = scmp.lt.s32.totalorder %s355_s10, %s355_s10 }
  0x2c   :  { %389 = vmatpush3.xpose.msk.msra.mxu0 %vm64_vm0, %v76_v4  ;;  %v294_v32 = vrot.slane %v269_v31, %v293_v30  ;;  %v310_v43 = vrot.slane %v269_v31, %v309_v37  ;;  %v326_v49 = vrot.slane %v269_v31, %v325_v40  ;;  %v342_v53 = vrot.slane %v269_v31, %v341_v45  ;;  %p481_p1 = scmp.ne.s32.totalorder %s355_s10, %s480_s11  ;;  %p486_p3 = scmp.lt.s32.totalorder %s480_s11, %s480_s11 }
  0x2d   :  { %390 = vmatprep.subr.msk.mxu0 %vm64_vm0, %v75_v6  ;;  %v177_v10 = vld [vmem:[#allocation3 + $0x8] sm:$0xff]  ;;  %v176_v12 = vld [vmem:[#allocation3] sm:$0xff] }
  0x2e   :  { %v73_v18 = vld [vmem:[#allocation2 + $0x8] sm:$0xff]  ;;  %v72_v21 = vld [vmem:[#allocation2] sm:$0xff]  ;;  %p487_p4 = por %p486_p3, %p485_p2 }
  0x30   :  { %391 = vmatpush3.xpose.msk.msra.mxu0 %vm64_vm0, %v75_v6  ;;  %p488_p5 = pnand %p487_p4, %p481_p1 }
  0x31   :  { %392 = vmatprep.subr.msk.mxu0 %vm64_vm0, %v74_v7 }
  0x34   :  { %393 = vmatpush3.xpose.msk.msra.mxu0 %vm64_vm0, %v74_v7 }
  0x37   :  { %395 = vmatmul.mubr.msk.f32.vlgmr.msra.gmra.mxu0 %vm64_vm0, %v71_v5 }
  0xeb   :  { %v401_v11 = vpop.f32.mrf.mxu1 }
  0xec   :  { %v258_v13 = vadd.f32 %v401_v11, %v177_v10 }
  0xed   :  { %v248_v14 = vpop.f32.mrf.mxu1 }
  0xee   :  { %261 = vst.msk [vmem:[#allocation3 + $0x8] sm:$0xff] %vm67_vm1, %v258_v13  ;;  %v257_v15 = vadd.f32 %v248_v14, %v176_v12 }
  0xf0   :  { %260 = vst.msk [vmem:[#allocation3] sm:$0xff] %vm67_vm1, %v257_v15 }
  0xf5   :  { %v266_v16 = vld [vmem:[#allocation3 + $0x8] sm:$0xff] }
  0xf6   :  { %v268_v17 = vmul.f32 0.25, %v266_v16 }
  0xf7   :  { %v265_v19 = vld [vmem:[#allocation3] sm:$0xff]  ;;  %v396_v20 = vpop.f32.mrf.mxu0 }
  0xf8   :  { %304 = vperm.xlu1 %414, %v268_v17   ;;  %288 = vperm.xlu0 %413, %v268_v17   ;;  %v173_v22 = vadd.f32 %v396_v20, %v73_v18  ;;  %v267_v23 = vmul.f32 0.25, %v265_v19 }
  0xf9   :  { %v163_v24 = vpop.f32.mrf.mxu0 }
  0xfa   :  { %175 = vst.msk [vmem:[#allocation2 + $0x8] sm:$0xff] %vm64_vm0, %v173_v22  ;;  %v172_v25 = vadd.f32 %v163_v24, %v72_v21 }
  0xfc   :  { %415 = vset.pattern.permute.xlu1 %v514_v26  ;;  %283 = vperm.xlu0 %413, %v267_v23   ;;  %174 = vst.msk [vmem:[#allocation2] sm:$0xff] %vm64_vm0, %v172_v25 }
  0xfd   :  { %320 = vperm.xlu1 %415, %v268_v17  }
 0x100   :  { %417 = vset.pattern.permute.xlu0 %v514_v26 }
 0x101   :  { %416 = vset.pattern.permute.xlu1 %v512_v8  ;;  %316 = vperm.xlu0 %417, %v267_v23   ;;  %v271_v36 = vld [vmem:[#allocation2 + $0x8] sm:$0xff] }
 0x102   :  { %300 = vperm.xlu1 %416, %v267_v23   ;;  %v280_v38 = vadd.f32 %v376_v34, %v271_v36 }
 0x103   :  { %v270_v42 = vld [vmem:[#allocation2] sm:$0xff] }
 0x104   :  { %v279_v47 = vadd.f32 %v376_v34, %v270_v42 }
 0x105   :  { %419 = vset.pattern.permute.xlu0 %v515_v27 }
 0x106   :  { %418 = vset.pattern.permute.xlu1 %v515_v27  ;;  %336 = vperm.xlu0 %419, %v268_v17  }
 0x107   :  { %332 = vperm.xlu1 %418, %v267_v23  }
 0x173   :  { %v305_v33 = vpop.permute.xlu1 %304  ;;  %v289_v35 = vpop.permute.xlu0 %288 }
 0x174   :  { %v296_v39 = vmul.f32 %v294_v32, %v289_v35  ;;  %v312_v50 = vmul.f32 %v310_v43, %v305_v33 }
 0x176   :  { %v298_v46 = vadd.f32 %v296_v39, %v280_v38 }
 0x177   :  { %v284_v41 = vpop.permute.xlu0 %283 }
 0x178   :  { %v321_v44 = vpop.permute.xlu1 %320  ;;  %v295_v48 = vmul.f32 %v294_v32, %v284_v41  ;;  %v314_v55 = vadd.f32 %v312_v50, %v298_v46 }
 0x179   :  { %v328_v56 = vmul.f32 %v326_v49, %v321_v44 }
 0x17a   :  { %v297_v54 = vadd.f32 %v295_v48, %v279_v47 }
 0x17b   :  { %v330_v61 = vadd.f32 %v328_v56, %v314_v55 }
 0x17c   :  { %v317_v51 = vpop.permute.xlu0 %316 }
 0x17d   :  { %v301_v52 = vpop.permute.xlu1 %300  ;;  %v327_v58 = vmul.f32 %v326_v49, %v317_v51 }
 0x17e   :  { %v311_v57 = vmul.f32 %v310_v43, %v301_v52 }
 0x180   :  { %v313_v59 = vadd.f32 %v311_v57, %v297_v54 }
 0x181   :  { %v337_v60 = vpop.permute.xlu0 %336 }
 0x182   :  { %v344_v62 = vmul.f32 %v342_v53, %v337_v60  ;;  %v333_v63 = vpop.permute.xlu1 %332  ;;  %v329_v0 = vadd.f32 %v327_v58, %v313_v59 }
 0x183   :  { %v343_v1 = vmul.f32 %v342_v53, %v333_v63 }
 0x184   :  { %v346_v2 = vadd.f32 %v344_v62, %v330_v61 }
 0x185   :  { %v345_v3 = vadd.f32 %v343_v1, %v329_v0 }
 0x186   :  { %348 = vst.msk [vmem:[#allocation10 + $0x8] sm:$0xff] %vm64_vm0, %v346_v2 }
 0x187   :  { %347 = vst.msk [vmem:[#allocation10] sm:$0xff] %vm64_vm0, %v345_v3 }
 0x188   :  { %491 = shalt.err (!%p488_p5)
}
 0x189   :  { %360 = dma.vmem_to_hbm [thread:$0]  %s355_s10, 256, %s603_s5, [#allocation6], %s508_s23, %s508_s23, %s509_s24  }
 0x18a   :  { %504 = dma.done.wait [#allocation6], 256  }
 0x18b   :  { %505 = vsyncadd [#allocation6], 4294967040 }
 0x18c   :  { %364 = vsyncpa [#allocation5], 1 }
 0x18d   :  { %365 = vsyncpa [#allocation8], 1 }
 0x18e   :  { %366 = vsyncpa [#allocation6], 1 }

</bundles_post_ra>
